<compile_context>
chip_gen: v7x
topology: tpu7x:2x2x1
jax: 0.10.0
libtpu: 0.0.40
codegen_flags: <defaults>
</compile_context>

<pallas_src>
import jax
import jax.numpy as jnp
from jax.experimental import pallas as pl
from jax.experimental.pallas import tpu as pltpu


# ---------------------------------------------------------------------------
# Pallas kernel: (N, Cin*H*W) @ (Cin*H*W, H*K*W*K) + bias  -> (N, H*K*W*K)
# Single MXU matmul, f32 accumulation, scalar bias from SMEM.
# ---------------------------------------------------------------------------
def _convT_expanded_matmul_kernel(b_ref, x_ref, w_ref, o_ref):
    o_ref[...] = (
        jnp.dot(x_ref[...], w_ref[...], preferred_element_type=jnp.float32)
        + b_ref[0]
    )


def conv_transpose2d_s4k4_flat(x_nchw, weight, bias):
    """ConvTranspose2d with kernel_size=4, stride=4, padding=0, Cout=1.

    x_nchw : (N, Cin, H, W)      float32
    weight : (Cin, 1, K, K)      float32   (PyTorch ConvTranspose2d layout)
    bias   : (1,)                float32
    returns: (N, H*K*W*K)        float32   -- row n is sample n's output image
                                             flattened in (oh, ow) order, i.e.
                                             the NCHW layout (Cout == 1).
    """
    N, Cin, H, W = x_nchw.shape
    Cin_w, Cout, K, _ = weight.shape
    assert Cin == Cin_w and Cout == 1

    P_in = Cin * H * W        # contraction dim  (= 256)
    P_out = H * K * W * K     # lane-dense output dim per sample (= 256)

    # LHS: (N, Cin*H*W) — pure metadata reshape of the contiguous NCHW tensor.
    x_flat = x_nchw.reshape(N, P_in)

    # Expanded / scattered weight:
    #   B[(ic, i, j), (i', ki, j', kj)] = W[ic, 0, ki, kj] * d(i, i') * d(j, j')
    # so the matmul output column (i'*K + ki)*(W*K) + (j'*K + kj) is exactly
    # the flattened (oh, ow) position of the strided output.
    eye_h = jnp.eye(H, dtype=weight.dtype)
    eye_w = jnp.eye(W, dtype=weight.dtype)
    w_b = jnp.einsum("cpq,ia,jb->cijapbq", weight[:, 0], eye_h, eye_w)
    w_b = w_b.reshape(P_in, P_out)

    out = pl.pallas_call(
        _convT_expanded_matmul_kernel,
        out_shape=jax.ShapeDtypeStruct((N, P_out), jnp.float32),
        in_specs=[
            pl.BlockSpec(memory_space=pltpu.MemorySpace.SMEM),   # bias scalar
            pl.BlockSpec((N, P_in), lambda: (0, 0)),             # activations
            pl.BlockSpec((P_in, P_out), lambda: (0, 0)),         # expanded W
        ],
        out_specs=pl.BlockSpec((N, P_out), lambda: (0, 0)),
    )(bias, x_flat, w_b)
    return out


def model_forward(x1, weight, bias):
    v1_rows = conv_transpose2d_s4k4_flat(x1, weight, bias)
    # TODO(synk): PyTorch's v1.reshape(1) is invalid here (4096 elements);
    #             return the flattened conv-transpose output instead.
    # Rows are already in NCHW flatten order (Cout == 1) -> metadata-only.
    return v1_rows.reshape(-1)


# ---------------------------------------------------------------------------
# Pure-JAX reference (for a quick self-check)
# ---------------------------------------------------------------------------
def _reference(x1, weight, bias):
    N, Cin, H, W = x1.shape
    _, Cout, K, _ = weight.shape
    patches = (
        jnp.einsum("nchw,codk->nhwodk", x1, weight)
        + bias[None, None, None, :, None, None]
    )
    out = jnp.transpose(patches, (0, 3, 1, 4, 2, 5)).reshape(N, Cout, H * K, W * K)
    return out.reshape(-1)


if __name__ == "__main__":
    key = jax.random.PRNGKey(0)
    k_x, k_w, k_b = jax.random.split(key, 3)

    # Shapes implied by the module: x1 = randn(16, 16, 4, 4)
    N, Cin, H, W = 16, 16, 4, 4
    Cout, K = 1, 4

    x1 = jax.random.normal(k_x, (N, Cin, H, W), dtype=jnp.float32)
    # Deterministic synthetic parameters (PyTorch ConvTranspose2d weight layout)
    weight = 0.1 * jax.random.normal(k_w, (Cin, Cout, K, K), dtype=jnp.float32)
    bias = 0.1 * jax.random.normal(k_b, (Cout,), dtype=jnp.float32)

    out = jax.jit(model_forward)(x1, weight, bias)
    out = jax.block_until_ready(out)

    ref = _reference(x1, weight, bias)
    assert out.shape == (N * Cout * H * K * W * K,)
    assert jnp.allclose(out, ref, atol=1e-5, rtol=1e-5)

    print("KERNEL_OK")
</pallas_src>

<mosaic_0001>
module attributes {stable_mosaic.version = 11 : i64} {
  func.func @_convT_expanded_matmul_kernel(%arg0: memref<1xf32, #tpu.memory_space<smem>>, %arg1: memref<16x256xf32, #tpu.memory_space<vmem>>, %arg2: memref<256x256xf32, #tpu.memory_space<vmem>>, %arg3: memref<16x256xf32, #tpu.memory_space<vmem>>) attributes {dimension_semantics = [], scalar_prefetch = 0 : i64, scratch_operands = 0 : i64, tpu.core_type = #tpu.core_type<tc>} {
    %c0 = arith.constant 0 : index
    %c0_0 = arith.constant 0 : index
    %0 = vector.load %arg1[%c0, %c0_0] : memref<16x256xf32, #tpu.memory_space<vmem>>, vector<16x256xf32>
    %c0_1 = arith.constant 0 : index
    %c0_2 = arith.constant 0 : index
    %1 = vector.load %arg2[%c0_1, %c0_2] : memref<256x256xf32, #tpu.memory_space<vmem>>, vector<256x256xf32>
    %cst = arith.constant dense<0.000000e+00> : vector<16x256xf32>
    %2 = tpu.matmul %0, %1, %cst {dimension_numbers = #tpu.dot_dimension_numbers<[1], [0], [0], [1], [0, 0, 1, 1], [], []>} : vector<16x256xf32>, vector<256x256xf32>, vector<16x256xf32> -> vector<16x256xf32>
    %c0_3 = arith.constant 0 : index
    %3 = memref.load %arg0[%c0_3] : memref<1xf32, #tpu.memory_space<smem>>
    %4 = vector.broadcast %3 : f32 to vector<16x256xf32>
    %5 = arith.addf %2, %4 : vector<16x256xf32>
    %c0_4 = arith.constant 0 : index
    %c0_5 = arith.constant 0 : index
    %6 = vector.load %arg3[%c0_4, %c0_5] : memref<16x256xf32, #tpu.memory_space<vmem>>, vector<16x256xf32>
    tpu.vector_store %arg3[%c0_4, %c0_5], %5 {strides = array<i32>} : memref<16x256xf32, #tpu.memory_space<vmem>>, vector<16x256xf32>,
    return
  }
}

</mosaic_0001>

<bundles_post_ra>
// kernel: model_forward.1
= control target key start
LH: loop header
LB: loop body
LE: loop exit
PB: predicated region body
PF: predicated region fallthrough
CT: control target
= control target key end

     0   :  { %s505_s2 = inlined_call_operand.vmem [shape: f32[256,256], index: 2, kind: input, shape index: {}]   ;;  %s506_s1 = inlined_call_operand.vmem [shape: f32[16,256], index: 1, kind: input, shape index: {}]   ;;  %s507_s0 = inlined_call_operand.<no memory space> [shape: f32[1], index: 0, kind: input, shape index: {}]   ;;  %s508_s3 = inlined_call_operand.vmem [shape: f32[16,256], index: 3, kind: output, shape index: {}]  }
   0x1   :  { %v20_v0 = vld [vmem:[%s505_s2 + $0x8] sm:$0xff]  ;;  %v22_v1 = vld [vmem:[%s505_s2 + $0x18] sm:$0xff]  ;;  %v19_v2 = vld [vmem:[%s505_s2] sm:$0xff] }
   0x2   :  { %v170_v3 = vpack.c.bf16 %v22_v1, %v20_v0  ;;  %v21_v4 = vld [vmem:[%s505_s2 + $0x10] sm:$0xff]  ;;  %v24_v5 = vld [vmem:[%s505_s2 + $0x28] sm:$0xff]  ;;  %v26_v6 = vld [vmem:[%s505_s2 + $0x38] sm:$0xff] }
   0x3   :  { %v172_v7 = vpack.c.bf16 %v21_v4, %v19_v2  ;;  %v174_v8 = vpack.c.bf16 %v26_v6, %v24_v5  ;;  %v23_v9 = vld [vmem:[%s505_s2 + $0x20] sm:$0xff]  ;;  %v25_v10 = vld [vmem:[%s505_s2 + $0x30] sm:$0xff]  ;;  %v28_v11 = vld [vmem:[%s505_s2 + $0x48] sm:$0xff] }
   0x4   :  { %171 = vmatprep.subr.bf16.mxu0 %v170_v3  ;;  %234 = vmatprep.subr.bf16.mxu1 %v170_v3  ;;  %v30_v12 = vld [vmem:[%s505_s2 + $0x58] sm:$0xff]  ;;  %v176_v13 = vpack.c.bf16 %v25_v10, %v23_v9  ;;  %v27_v15 = vld [vmem:[%s505_s2 + $0x40] sm:$0xff]  ;;  %v29_v16 = vld [vmem:[%s505_s2 + $0x50] sm:$0xff] }
   0x5   :  { %173 = vmatpush1.bf16.msra.mxu0 %v172_v7  ;;  %250 = vmatpush1.bf16.msra.mxu1 %v172_v7  ;;  %v178_v14 = vpack.c.bf16 %v30_v12, %v28_v11  ;;  %v32_v17 = vld [vmem:[%s505_s2 + $0x68] sm:$0xff]  ;;  %v34_v18 = vld [vmem:[%s505_s2 + $0x78] sm:$0xff]  ;;  %v180_v19 = vpack.c.bf16 %v29_v16, %v27_v15  ;;  %v31_v21 = vld [vmem:[%s505_s2 + $0x60] sm:$0xff] }
   0x6   :  { %175 = vmatprep.subr.bf16.mxu0 %v174_v8  ;;  %235 = vmatprep.subr.bf16.mxu1 %v174_v8  ;;  %v182_v20 = vpack.c.bf16 %v34_v18, %v32_v17  ;;  %v33_v22 = vld [vmem:[%s505_s2 + $0x70] sm:$0xff]  ;;  %v36_v23 = vld [vmem:[%s505_s2 + $0x88] sm:$0xff]  ;;  %v38_v24 = vld [vmem:[%s505_s2 + $0x98] sm:$0xff] }
   0x7   :  { %v184_v25 = vpack.c.bf16 %v33_v22, %v31_v21  ;;  %v186_v26 = vpack.c.bf16 %v38_v24, %v36_v23  ;;  %v35_v27 = vld [vmem:[%s505_s2 + $0x80] sm:$0xff]  ;;  %v37_v28 = vld [vmem:[%s505_s2 + $0x90] sm:$0xff]  ;;  %v40_v29 = vld [vmem:[%s505_s2 + $0xa8] sm:$0xff] }
   0x8   :  { %v42_v30 = vld [vmem:[%s505_s2 + $0xb8] sm:$0xff]  ;;  %v188_v31 = vpack.c.bf16 %v37_v28, %v35_v27  ;;  %v39_v33 = vld [vmem:[%s505_s2 + $0xa0] sm:$0xff]  ;;  %v41_v34 = vld [vmem:[%s505_s2 + $0xb0] sm:$0xff] }
   0x9   :  { %177 = vmatpush1.bf16.msra.mxu0 %v176_v13  ;;  %251 = vmatpush1.bf16.msra.mxu1 %v176_v13  ;;  %v190_v32 = vpack.c.bf16 %v42_v30, %v40_v29  ;;  %v44_v35 = vld [vmem:[%s505_s2 + $0xc8] sm:$0xff]  ;;  %v46_v36 = vld [vmem:[%s505_s2 + $0xd8] sm:$0xff]  ;;  %v192_v37 = vpack.c.bf16 %v41_v34, %v39_v33  ;;  %v43_v38 = vld [vmem:[%s505_s2 + $0xc0] sm:$0xff] }
   0xa   :  { %179 = vmatprep.subr.bf16.mxu0 %v178_v14  ;;  %236 = vmatprep.subr.bf16.mxu1 %v178_v14  ;;  %v194_v39 = vpack.c.bf16 %v46_v36, %v44_v35  ;;  %v45_v40 = vld [vmem:[%s505_s2 + $0xd0] sm:$0xff]  ;;  %v16_v41 = vld [vmem:[%s506_s1 + $0x8] sm:$0xff]  ;;  %v18_v42 = vld [vmem:[%s506_s1 + $0x18] sm:$0xff]  ;;  %v84_v36 = vstv %s507_s0 }
   0xb   :  { %v48_v43 = vld [vmem:[%s505_s2 + $0xe8] sm:$0xff]  ;;  %v50_v44 = vld [vmem:[%s505_s2 + $0xf8] sm:$0xff]  ;;  %149 = vmatprep.mubr.f32.mxu0 %v16_v41  ;;  %155 = vmatprep.mubr.f32.mxu1 %v18_v42  ;;  %v196_v45 = vpack.c.bf16 %v45_v40, %v43_v38  ;;  %v47_v47 = vld [vmem:[%s505_s2 + $0xe0] sm:$0xff] }
   0xc   :  { %v198_v46 = vpack.c.bf16 %v50_v44, %v48_v43  ;;  %v49_v48 = vld [vmem:[%s505_s2 + $0xf0] sm:$0xff]  ;;  %v52_v49 = vld [vmem:[%s505_s2 + $0x108] sm:$0xff]  ;;  %v54_v50 = vld [vmem:[%s505_s2 + $0x118] sm:$0xff] }
   0xd   :  { %181 = vmatpush1.bf16.msra.mxu0 %v180_v19  ;;  %252 = vmatpush1.bf16.msra.mxu1 %v180_v19  ;;  %v200_v51 = vpack.c.bf16 %v49_v48, %v47_v47  ;;  %v202_v52 = vpack.c.bf16 %v54_v50, %v52_v49  ;;  %v51_v53 = vld [vmem:[%s505_s2 + $0x100] sm:$0xff]  ;;  %v53_v54 = vld [vmem:[%s505_s2 + $0x110] sm:$0xff]  ;;  %v56_v55 = vld [vmem:[%s505_s2 + $0x128] sm:$0xff] }
   0xe   :  { %183 = vmatprep.subr.bf16.mxu0 %v182_v20  ;;  %237 = vmatprep.subr.bf16.mxu1 %v182_v20  ;;  %v58_v56 = vld [vmem:[%s505_s2 + $0x138] sm:$0xff]  ;;  %v204_v57 = vpack.c.bf16 %v53_v54, %v51_v53  ;;  %v55_v59 = vld [vmem:[%s505_s2 + $0x120] sm:$0xff]  ;;  %v57_v60 = vld [vmem:[%s505_s2 + $0x130] sm:$0xff] }
   0xf   :  { %v206_v58 = vpack.c.bf16 %v58_v56, %v56_v55  ;;  %v60_v61 = vld [vmem:[%s505_s2 + $0x148] sm:$0xff]  ;;  %v62_v62 = vld [vmem:[%s505_s2 + $0x158] sm:$0xff]  ;;  %v208_v63 = vpack.c.bf16 %v57_v60, %v55_v59  ;;  %v59_v1 = vld [vmem:[%s505_s2 + $0x140] sm:$0xff] }
  0x10   :  { %v210_v0 = vpack.c.bf16 %v62_v62, %v60_v61  ;;  %v61_v2 = vld [vmem:[%s505_s2 + $0x150] sm:$0xff]  ;;  %v64_v3 = vld [vmem:[%s505_s2 + $0x168] sm:$0xff]  ;;  %v66_v4 = vld [vmem:[%s505_s2 + $0x178] sm:$0xff] }
  0x11   :  { %185 = vmatpush1.bf16.msra.mxu0 %v184_v25  ;;  %253 = vmatpush1.bf16.msra.mxu1 %v184_v25  ;;  %v212_v5 = vpack.c.bf16 %v61_v2, %v59_v1  ;;  %v214_v6 = vpack.c.bf16 %v66_v4, %v64_v3  ;;  %v63_v7 = vld [vmem:[%s505_s2 + $0x160] sm:$0xff]  ;;  %v65_v8 = vld [vmem:[%s505_s2 + $0x170] sm:$0xff]  ;;  %v68_v9 = vld [vmem:[%s505_s2 + $0x188] sm:$0xff] }
  0x12   :  { %187 = vmatprep.subr.bf16.mxu0 %v186_v26  ;;  %238 = vmatprep.subr.bf16.mxu1 %v186_v26  ;;  %v70_v10 = vld [vmem:[%s505_s2 + $0x198] sm:$0xff]  ;;  %v216_v11 = vpack.c.bf16 %v65_v8, %v63_v7  ;;  %v67_v13 = vld [vmem:[%s505_s2 + $0x180] sm:$0xff]  ;;  %v69_v14 = vld [vmem:[%s505_s2 + $0x190] sm:$0xff] }
  0x13   :  { %v218_v12 = vpack.c.bf16 %v70_v10, %v68_v9  ;;  %v72_v15 = vld [vmem:[%s505_s2 + $0x1a8] sm:$0xff]  ;;  %v74_v16 = vld [vmem:[%s505_s2 + $0x1b8] sm:$0xff]  ;;  %v220_v17 = vpack.c.bf16 %v69_v14, %v67_v13  ;;  %v71_v19 = vld [vmem:[%s505_s2 + $0x1a0] sm:$0xff] }
  0x14   :  { %v222_v18 = vpack.c.bf16 %v74_v16, %v72_v15  ;;  %v73_v20 = vld [vmem:[%s505_s2 + $0x1b0] sm:$0xff]  ;;  %v76_v21 = vld [vmem:[%s505_s2 + $0x1c8] sm:$0xff]  ;;  %v78_v22 = vld [vmem:[%s505_s2 + $0x1d8] sm:$0xff] }
  0x15   :  { %189 = vmatpush1.bf16.msra.mxu0 %v188_v31  ;;  %254 = vmatpush1.bf16.msra.mxu1 %v188_v31  ;;  %v224_v23 = vpack.c.bf16 %v73_v20, %v71_v19  ;;  %v226_v24 = vpack.c.bf16 %v78_v22, %v76_v21  ;;  %v75_v25 = vld [vmem:[%s505_s2 + $0x1c0] sm:$0xff]  ;;  %v77_v26 = vld [vmem:[%s505_s2 + $0x1d0] sm:$0xff]  ;;  %v80_v27 = vld [vmem:[%s505_s2 + $0x1e8] sm:$0xff] }
  0x16   :  { %191 = vmatprep.subr.bf16.mxu0 %v190_v32  ;;  %239 = vmatprep.subr.bf16.mxu1 %v190_v32  ;;  %v82_v28 = vld [vmem:[%s505_s2 + $0x1f8] sm:$0xff]  ;;  %v228_v29 = vpack.c.bf16 %v77_v26, %v75_v25  ;;  %v79_v31 = vld [vmem:[%s505_s2 + $0x1e0] sm:$0xff]  ;;  %v81_v32 = vld [vmem:[%s505_s2 + $0x1f0] sm:$0xff] }
  0x17   :  { %v230_v30 = vpack.c.bf16 %v82_v28, %v80_v27  ;;  %v232_v33 = vpack.c.bf16 %v81_v32, %v79_v31  ;;  %v15_v34 = vld [vmem:[%s506_s1] sm:$0xff]  ;;  %v17_v35 = vld [vmem:[%s506_s1 + $0x10] sm:$0xff] }
  0x19   :  { %193 = vmatpush1.bf16.msra.mxu0 %v192_v37  ;;  %255 = vmatpush1.bf16.msra.mxu1 %v192_v37 }
  0x1a   :  { %195 = vmatprep.subr.bf16.mxu0 %v194_v39  ;;  %240 = vmatprep.subr.bf16.mxu1 %v194_v39 }
  0x1d   :  { %197 = vmatpush1.bf16.msra.mxu0 %v196_v45  ;;  %256 = vmatpush1.bf16.msra.mxu1 %v196_v45 }
  0x1e   :  { %199 = vmatprep.subr.bf16.mxu0 %v198_v46  ;;  %241 = vmatprep.subr.bf16.mxu1 %v198_v46 }
  0x21   :  { %201 = vmatpush1.bf16.msra.mxu0 %v200_v51  ;;  %257 = vmatpush1.bf16.msra.mxu1 %v200_v51 }
  0x22   :  { %203 = vmatprep.subr.bf16.mxu0 %v202_v52  ;;  %242 = vmatprep.subr.bf16.mxu1 %v202_v52 }
  0x25   :  { %205 = vmatpush1.bf16.msra.mxu0 %v204_v57  ;;  %258 = vmatpush1.bf16.msra.mxu1 %v204_v57 }
  0x26   :  { %207 = vmatprep.subr.bf16.mxu0 %v206_v58  ;;  %243 = vmatprep.subr.bf16.mxu1 %v206_v58 }
  0x29   :  { %209 = vmatpush1.bf16.msra.mxu0 %v208_v63  ;;  %259 = vmatpush1.bf16.msra.mxu1 %v208_v63 }
  0x2a   :  { %211 = vmatprep.subr.bf16.mxu0 %v210_v0  ;;  %244 = vmatprep.subr.bf16.mxu1 %v210_v0 }
  0x2d   :  { %213 = vmatpush1.bf16.msra.mxu0 %v212_v5  ;;  %260 = vmatpush1.bf16.msra.mxu1 %v212_v5 }
  0x2e   :  { %215 = vmatprep.subr.bf16.mxu0 %v214_v6  ;;  %245 = vmatprep.subr.bf16.mxu1 %v214_v6 }
  0x31   :  { %217 = vmatpush1.bf16.msra.mxu0 %v216_v11  ;;  %261 = vmatpush1.bf16.msra.mxu1 %v216_v11 }
  0x32   :  { %219 = vmatprep.subr.bf16.mxu0 %v218_v12  ;;  %246 = vmatprep.subr.bf16.mxu1 %v218_v12 }
  0x35   :  { %221 = vmatpush1.bf16.msra.mxu0 %v220_v17  ;;  %262 = vmatpush1.bf16.msra.mxu1 %v220_v17 }
  0x36   :  { %223 = vmatprep.subr.bf16.mxu0 %v222_v18  ;;  %247 = vmatprep.subr.bf16.mxu1 %v222_v18 }
  0x39   :  { %225 = vmatpush1.bf16.msra.mxu0 %v224_v23  ;;  %263 = vmatpush1.bf16.msra.mxu1 %v224_v23 }
  0x3a   :  { %227 = vmatprep.subr.bf16.mxu0 %v226_v24  ;;  %248 = vmatprep.subr.bf16.mxu1 %v226_v24 }
  0x3d   :  { %229 = vmatpush1.bf16.msra.mxu0 %v228_v29  ;;  %264 = vmatpush1.bf16.msra.mxu1 %v228_v29 }
  0x3e   :  { %231 = vmatprep.subr.bf16.mxu0 %v230_v30  ;;  %249 = vmatprep.subr.bf16.mxu1 %v230_v30 }
  0x41   :  { %233 = vmatpush1.bf16.msra.mxu0 %v232_v33  ;;  %265 = vmatpush1.bf16.msra.mxu1 %v232_v33 }
  0x44   :  { %150 = vmatmul.mubr.f32.vlgmr.msra.gmra.mrb[0].mxu0 %v15_v34  ;;  %156 = vmatmul.mubr.f32.vlgmr.msra.gmra.mrb[0].mxu1 %v17_v35 }
 0x117   :  { %v151_v37 = vpop.f32.mrb[0].mxu0  ;;  %v157_v38 = vpop.f32.mrb[0].mxu1 }
 0x118   :  { %v152_v39 = vadd.f32 %v151_v37, %v84_v36  ;;  %v158_v40 = vadd.f32 %v157_v38, %v84_v36  ;;  %v153_v41 = vpop.f32.mrb[1].mxu0  ;;  %v159_v42 = vpop.f32.mrb[1].mxu1 }
 0x119   :  { %v154_v43 = vadd.f32 %v153_v41, %v84_v36  ;;  %v160_v44 = vadd.f32 %v159_v42, %v84_v36 }
 0x11a   :  { %162 = vst [vmem:[%s508_s3] sm:$0xff] %v152_v39  ;;  %164 = vst [vmem:[%s508_s3 + $0x10] sm:$0xff] %v158_v40 }
 0x11b   :  { %163 = vst [vmem:[%s508_s3 + $0x8] sm:$0xff] %v154_v43  ;;  %165 = vst [vmem:[%s508_s3 + $0x18] sm:$0xff] %v160_v44 }

</bundles_post_ra>
